<compile_context>
chip_gen: v6e
topology: v6e:2x2x1
jax: 0.10.0
libtpu: 0.0.40
codegen_flags: <defaults>
</compile_context>

<pallas_src>
import jax
import jax.numpy as jnp
from jax.experimental import pallas as pl
from jax.experimental.pallas import tpu as pltpu


def _round_up(x, m):
    return ((x + m - 1) // m) * m


def _mlp_kernel(x_ref, w1_ref, b1_ref, w2_ref, b2_ref, o_ref, h_ref):
    # Layer 0 (Linear + ReLU): run once per M tile (first N step); the hidden
    # activation persists in a VMEM scratch across the N tiles of layer 1.
    # Bias add / ReLU run in f32 on the VPU (free filler under MXU slack).
    @pl.when(pl.program_id(1) == 0)
    def _():
        h = jnp.dot(x_ref[...], w1_ref[...], preferred_element_type=jnp.float32)
        h_ref[...] = jnp.maximum(h + b1_ref[...], 0.0).astype(h_ref.dtype)

    # Layer 1 (final Linear, no activation): f32 MXU accumulation.
    y = jnp.dot(h_ref[...], w2_ref[...], preferred_element_type=jnp.float32)
    o_ref[...] = (y + b2_ref[...]).astype(o_ref.dtype)


def prepare_mlp_params(params, *, use_bf16=False):
    """One-time param prep (hoisted out of the per-call path):
    pad hidden/output feature dims to lane-dense multiples of 128 and cast
    weights to the MXU operand dtype. Zero-padded hidden units give
    relu(0)=0 and hit zero rows of W2, so results are unchanged."""
    w1, b1, w2, b2 = params["w1"], params["b1"], params["w2"], params["b2"]
    d_in, d_hid = w1.shape
    d_out = w2.shape[1]
    hp = _round_up(d_hid, 128)
    dp = _round_up(d_out, 128)
    if hp != d_hid:
        w1 = jnp.pad(w1, ((0, 0), (0, hp - d_hid)))
        b1 = jnp.pad(b1, ((0, hp - d_hid),))
        w2 = jnp.pad(w2, ((0, hp - d_hid), (0, 0)))
    if dp != d_out:
        w2 = jnp.pad(w2, ((0, 0), (0, dp - d_out)))
        b2 = jnp.pad(b2, ((0, dp - d_out),))
    wdt = jnp.bfloat16 if use_bf16 else jnp.float32
    return {
        "w1": w1.astype(wdt),
        "w2": w2.astype(wdt),
        # Biases stay f32 so bias-add / ReLU happen in f32 even on bf16 path.
        "b1": b1.reshape(1, hp).astype(jnp.float32),
        "b2": b2.reshape(1, dp).astype(jnp.float32),
        "d_out": d_out,
        "use_bf16": use_bf16,
        "_prepared": True,
    }


def mlp_pallas(x, params, *, block_m=512, block_n=None):
    """x: [..., D_in] -> [..., D_out] (two-layer MLP, ReLU in between)."""
    if not isinstance(params, dict) or not params.get("_prepared", False):
        params = prepare_mlp_params(params)
    w1, b1, w2, b2 = params["w1"], params["b1"], params["w2"], params["b2"]
    d_out = params["d_out"]
    use_bf16 = params["use_bf16"]

    orig_shape = x.shape
    d_in = orig_shape[-1]
    hp = w1.shape[1]
    dp = w2.shape[1]
    out_dtype = x.dtype

    x2 = x.reshape(-1, d_in)
    if use_bf16:
        x2 = x2.astype(jnp.bfloat16)
    m = x2.shape[0]

    x_item = jnp.dtype(x2.dtype).itemsize
    w_item = jnp.dtype(w1.dtype).itemsize
    o_item = jnp.dtype(out_dtype).itemsize
    h_item = w_item  # hidden scratch stored in the layer-1 MXU operand dtype

    # ---- Chip-aware VMEM budget (v7x: 64 MiB per TensorCore) ----
    try:
        vmem_cap = int(pltpu.get_tpu_info().vmem_capacity_bytes)
    except Exception:
        vmem_cap = 64 << 20  # conservative capacity fallback (v7x per-TC)
    vmem_budget = int(0.85 * vmem_cap)

    # ---- Output-feature (N) tiling when resident weights don't fit ----
    w1_bytes = d_in * hp * w_item
    if block_n is not None:
        tn = max(128, min(dp, _round_up(block_n, 128)))
    else:
        tn = dp
        weight_budget = vmem_budget // 2  # keep >= half for streamed tiles
        if w1_bytes + hp * dp * w_item > weight_budget:
            tn_max = max((weight_budget - w1_bytes) // (2 * hp * w_item), 128)
            tn = max(128, min(dp, (tn_max // 128) * 128))
    n_tiles = pl.cdiv(dp, tn)

    # W1/b1 (and W2/b2 when not N-tiled) have a constant block index: single
    # buffer them. N-tiled W2/b2 keep default double buffering for overlap.
    w2_buffers = 1 if n_tiles == 1 else 2
    weight_bytes = (w1_bytes + w2_buffers * hp * tn * w_item
                    + 2 * (hp + w2_buffers * tn) * 4)

    # ---- M tile: big (amortize ~0.35us/step), VMEM-capped, and with enough
    #      grid steps to balance v7x's two TensorCores when M is large ----
    bm = min(_round_up(block_m, 8), _round_up(m, 8))
    if m >= 8 * 512:
        bm = min(bm, _round_up(pl.cdiv(m, 8), 256))
    # per-row VMEM: 2x-buffered x tile, 2x-buffered out tile, h scratch, plus
    # headroom for the compiler-managed f32 matmul intermediates.
    per_row = (2 * d_in * x_item + 2 * tn * o_item + hp * h_item
               + (hp + tn) * 4)
    bm_fit = (vmem_budget - weight_bytes) // max(per_row, 1)
    bm = max(8, min(bm, max(8, (bm_fit // 8) * 8)))
    grid = (pl.cdiv(m, bm), n_tiles)

    vmem_bytes = int(weight_bytes + bm * per_row)
    vmem_bytes = int(min(max(int(vmem_bytes * 1.15), 4 << 20), vmem_budget))

    def _const(shape):
        # Constant block index for every grid step -> never re-DMA'd; a
        # second buffer would be pure wasted VMEM.
        return pl.BlockSpec(shape, lambda i, j: (0, 0),
                            pipeline_mode=pl.Buffered(1))

    if n_tiles == 1:
        w2_spec = pl.BlockSpec((hp, tn), lambda i, j: (0, j),
                               pipeline_mode=pl.Buffered(1))
        b2_spec = pl.BlockSpec((1, tn), lambda i, j: (0, j),
                               pipeline_mode=pl.Buffered(1))
    else:
        w2_spec = pl.BlockSpec((hp, tn), lambda i, j: (0, j))
        b2_spec = pl.BlockSpec((1, tn), lambda i, j: (0, j))

    flops = 2 * m * (d_in * hp + hp * dp)
    w2_traffic = hp * dp * w_item * (1 if n_tiles == 1 else pl.cdiv(m, bm))
    bytes_accessed = int(m * d_in * x_item + w1_bytes + w2_traffic
                         + (hp + dp) * 4 + m * dp * o_item)

    out = pl.pallas_call(
        _mlp_kernel,
        out_shape=jax.ShapeDtypeStruct((m, dp), out_dtype),
        grid_spec=pltpu.PrefetchScalarGridSpec(
            num_scalar_prefetch=0,
            grid=grid,
            in_specs=[
                pl.BlockSpec((bm, d_in), lambda i, j: (i, 0)),  # x (streamed)
                _const((d_in, hp)),                             # W1 (resident)
                _const((1, hp)),                                # b1 (resident)
                w2_spec,                                        # W2 (N-tiled)
                b2_spec,                                        # b2
            ],
            out_specs=pl.BlockSpec((bm, tn), lambda i, j: (i, j)),
            scratch_shapes=[pltpu.VMEM((bm, hp), w2.dtype)],    # hidden h
        ),
        compiler_params=pltpu.CompilerParams(
            dimension_semantics=("parallel", "arbitrary"),
            vmem_limit_bytes=vmem_bytes),
        cost_estimate=pl.CostEstimate(flops=flops, transcendentals=0,
                                      bytes_accessed=bytes_accessed),
    )(x2, w1, b1, w2, b2)

    if dp != d_out:
        out = out[:, :d_out]
    return out.reshape(*orig_shape[:-1], d_out)


def mlp_forward(x, params, need_fp=False, *, dropout_p=0.2, key=None,
                block_m=512, block_n=None):
    """Mirrors MLP.forward. need_fp=True additionally returns a dropped-out copy."""
    y = mlp_pallas(x, params, block_m=block_m, block_n=block_n)
    if need_fp:
        # Dropout is elementwise glue; done in plain JAX (inverted dropout).
        keep = jax.random.bernoulli(key, 1.0 - dropout_p, y.shape)
        y_fp = jnp.where(keep, y / (1.0 - dropout_p), 0.0).astype(y.dtype)
        return y, y_fp
    return y


def init_mlp_params(key, input_dim, hidden_dim, output_dim, dtype=jnp.float32):
    """nn.Linear default init (uniform +-1/sqrt(fan_in)); weights stored (in, out)."""
    k1, k2, k3, k4 = jax.random.split(key, 4)
    bound1 = 1.0 / jnp.sqrt(input_dim)
    bound2 = 1.0 / jnp.sqrt(hidden_dim)
    return {
        "w1": jax.random.uniform(k1, (input_dim, hidden_dim), dtype, -bound1, bound1),
        "b1": jax.random.uniform(k2, (hidden_dim,), dtype, -bound1, bound1),
        "w2": jax.random.uniform(k3, (hidden_dim, output_dim), dtype, -bound2, bound2),
        "b2": jax.random.uniform(k4, (output_dim,), dtype, -bound2, bound2),
    }


def _ref_mlp(x, params):
    h = jnp.maximum(x @ params["w1"] + params["b1"], 0.0)
    return h @ params["w2"] + params["b2"]


if __name__ == "__main__":
    root = jax.random.PRNGKey(0)
    k_param, k_x, k_drop, k_param2, k_x2, k_param3, k_x3 = jax.random.split(root, 7)

    # --- Check 1: small, non-128-aligned dims (exercises feature-dim padding) ---
    batch, seq = 2, 8
    input_dim, hidden_dim, output_dim = 32, 32, 32
    params = init_mlp_params(k_param, input_dim, hidden_dim, output_dim)
    prep = prepare_mlp_params(params)                 # hoisted pad/cast, f32 path
    x = jax.random.normal(k_x, (batch, seq, input_dim), dtype=jnp.float32)

    y = jax.block_until_ready(mlp_forward(x, prep))
    y_ref = _ref_mlp(x, params)
    assert y.shape == (batch, seq, output_dim)
    assert jnp.allclose(y, y_ref, atol=1e-5, rtol=1e-5)

    # bf16 MXU-operand path (f32 accumulation), tolerance-appropriate check.
    prep_bf16 = prepare_mlp_params(params, use_bf16=True)
    y_bf = jax.block_until_ready(mlp_forward(x, prep_bf16))
    assert jnp.allclose(y_bf, y_ref, atol=3e-2, rtol=3e-2)

    # need_fp path (dropout applied in glue)
    y2, y_fp = mlp_forward(x, prep, need_fp=True, dropout_p=0.2, key=k_drop)
    jax.block_until_ready(y_fp)
    assert y_fp.shape == y2.shape

    # --- Check 2: module-default 128-wide dims, ragged M tile (600 % 512 != 0) ---
    params2 = init_mlp_params(k_param2, 128, 128, 128)
    prep2 = prepare_mlp_params(params2)
    x2 = jax.random.normal(k_x2, (2, 300, 128), dtype=jnp.float32)
    y2b = jax.block_until_ready(mlp_forward(x2, prep2))
    y2b_ref = _ref_mlp(x2, params2)
    assert y2b.shape == (2, 300, 128)
    assert jnp.allclose(y2b, y2b_ref, atol=1e-3, rtol=1e-3)

    # --- Check 3: forced output-feature (N) tiling path: h scratch reused across
    #     N tiles, W2 streamed per 128-wide tile ---
    params3 = init_mlp_params(k_param3, 128, 128, 384)
    prep3 = prepare_mlp_params(params3)
    x3 = jax.random.normal(k_x3, (2, 40, 128), dtype=jnp.float32)
    y3 = jax.block_until_ready(mlp_forward(x3, prep3, block_n=128))
    y3_ref = _ref_mlp(x3, params3)
    assert y3.shape == (2, 40, 384)
    assert jnp.allclose(y3, y3_ref, atol=1e-3, rtol=1e-3)

    print("KERNEL_OK")
</pallas_src>

<mosaic_0001>
module attributes {stable_mosaic.version = 11 : i64} {
  func.func @_mlp_kernel(%arg0: i32, %arg1: i32, %arg2: memref<16x32xf32, #tpu.memory_space<vmem>>, %arg3: memref<32x128xf32, #tpu.memory_space<vmem>>, %arg4: memref<1x128xf32, #tpu.memory_space<vmem>>, %arg5: memref<128x128xf32, #tpu.memory_space<vmem>>, %arg6: memref<1x128xf32, #tpu.memory_space<vmem>>, %arg7: memref<16x128xf32, #tpu.memory_space<vmem>>, %arg8: memref<16x128xf32, #tpu.memory_space<vmem>>) attributes {dimension_semantics = [#tpu.dimension_semantics<parallel>, #tpu.dimension_semantics<arbitrary>], iteration_bounds = array<i64: 1, 1>, scalar_prefetch = 0 : i64, scratch_operands = 1 : i64, tpu.core_type = #tpu.core_type<tc>, window_params = [{transform_indices = @transform_0, window_bounds = array<i64: 16, 32>}, {pipeline_mode = #tpu.pipeline_mode<synchronous>, transform_indices = @transform_1, window_bounds = array<i64: 32, 128>}, {pipeline_mode = #tpu.pipeline_mode<synchronous>, transform_indices = @transform_2, window_bounds = array<i64: 1, 128>}, {pipeline_mode = #tpu.pipeline_mode<synchronous>, transform_indices = @transform_3, window_bounds = array<i64: 128, 128>}, {pipeline_mode = #tpu.pipeline_mode<synchronous>, transform_indices = @transform_4, window_bounds = array<i64: 1, 128>}, {transform_indices = @transform_5, window_bounds = array<i64: 16, 128>}]} {
    %c0_i32 = arith.constant 0 : i32
    %0 = arith.cmpi eq, %arg1, %c0_i32 : i32
    %1 = arith.extui %0 : i1 to i32
    %c0_i32_0 = arith.constant 0 : i32
    %2 = arith.cmpi ne, %1, %c0_i32_0 : i32
    scf.if %2 {
      %c0_8 = arith.constant 0 : index
      %c0_9 = arith.constant 0 : index
      %10 = vector.load %arg2[%c0_8, %c0_9] : memref<16x32xf32, #tpu.memory_space<vmem>>, vector<16x32xf32>
      %c0_10 = arith.constant 0 : index
      %c0_11 = arith.constant 0 : index
      %11 = vector.load %arg3[%c0_10, %c0_11] : memref<32x128xf32, #tpu.memory_space<vmem>>, vector<32x128xf32>
      %cst_12 = arith.constant dense<0.000000e+00> : vector<16x128xf32>
      %12 = tpu.matmul %10, %11, %cst_12 {dimension_numbers = #tpu.dot_dimension_numbers<[1], [0], [0], [1], [0, 0, 1, 1], [], []>} : vector<16x32xf32>, vector<32x128xf32>, vector<16x128xf32> -> vector<16x128xf32>
      %c0_13 = arith.constant 0 : index
      %c0_14 = arith.constant 0 : index
      %13 = vector.load %arg4[%c0_13, %c0_14] : memref<1x128xf32, #tpu.memory_space<vmem>>, vector<1x128xf32>
      %14 = vector.broadcast %13 : vector<1x128xf32> to vector<16x128xf32>
      %15 = arith.addf %12, %14 : vector<16x128xf32>
      %cst_15 = arith.constant 0.000000e+00 : f32
      %16 = vector.broadcast %cst_15 : f32 to vector<16x128xf32>
      %17 = arith.maximumf %15, %16 : vector<16x128xf32>
      %c0_16 = arith.constant 0 : index
      %c0_17 = arith.constant 0 : index
      %18 = vector.load %arg8[%c0_16, %c0_17] : memref<16x128xf32, #tpu.memory_space<vmem>>, vector<16x128xf32>
      tpu.vector_store %arg8[%c0_16, %c0_17], %17 {strides = array<i32>} : memref<16x128xf32, #tpu.memory_space<vmem>>, vector<16x128xf32>,
    } else {
    }
    %c0 = arith.constant 0 : index
    %c0_1 = arith.constant 0 : index
    %3 = vector.load %arg8[%c0, %c0_1] : memref<16x128xf32, #tpu.memory_space<vmem>>, vector<16x128xf32>
    %c0_2 = arith.constant 0 : index
    %c0_3 = arith.constant 0 : index
    %4 = vector.load %arg5[%c0_2, %c0_3] : memref<128x128xf32, #tpu.memory_space<vmem>>, vector<128x128xf32>
    %cst = arith.constant dense<0.000000e+00> : vector<16x128xf32>
    %5 = tpu.matmul %3, %4, %cst {dimension_numbers = #tpu.dot_dimension_numbers<[1], [0], [0], [1], [0, 0, 1, 1], [], []>} : vector<16x128xf32>, vector<128x128xf32>, vector<16x128xf32> -> vector<16x128xf32>
    %c0_4 = arith.constant 0 : index
    %c0_5 = arith.constant 0 : index
    %6 = vector.load %arg6[%c0_4, %c0_5] : memref<1x128xf32, #tpu.memory_space<vmem>>, vector<1x128xf32>
    %7 = vector.broadcast %6 : vector<1x128xf32> to vector<16x128xf32>
    %8 = arith.addf %5, %7 : vector<16x128xf32>
    %c0_6 = arith.constant 0 : index
    %c0_7 = arith.constant 0 : index
    %9 = vector.load %arg7[%c0_6, %c0_7] : memref<16x128xf32, #tpu.memory_space<vmem>>, vector<16x128xf32>
    tpu.vector_store %arg7[%c0_6, %c0_7], %8 {strides = array<i32>} : memref<16x128xf32, #tpu.memory_space<vmem>>, vector<16x128xf32>,
    return
  }
  func.func @transform_0(%arg0: i32, %arg1: i32) -> (i32, i32) {
    %c0_i32 = arith.constant 0 : i32
    %c0_i32_0 = arith.constant 0 : i32
    return %arg0, %c0_i32 : i32, i32
  }
  func.func @transform_1(%arg0: i32, %arg1: i32) -> (i32, i32) {
    %c0_i32 = arith.constant 0 : i32
    %c0_i32_0 = arith.constant 0 : i32
    %c0_i32_1 = arith.constant 0 : i32
    return %c0_i32, %c0_i32_0 : i32, i32
  }
  func.func @transform_2(%arg0: i32, %arg1: i32) -> (i32, i32) {
    %c0_i32 = arith.constant 0 : i32
    %c0_i32_0 = arith.constant 0 : i32
    %c0_i32_1 = arith.constant 0 : i32
    return %c0_i32, %c0_i32_0 : i32, i32
  }
  func.func @transform_3(%arg0: i32, %arg1: i32) -> (i32, i32) {
    %c0_i32 = arith.constant 0 : i32
    %c0_i32_0 = arith.constant 0 : i32
    return %c0_i32, %arg1 : i32, i32
  }
  func.func @transform_4(%arg0: i32, %arg1: i32) -> (i32, i32) {
    %c0_i32 = arith.constant 0 : i32
    %c0_i32_0 = arith.constant 0 : i32
    return %c0_i32, %arg1 : i32, i32
  }
  func.func @transform_5(%arg0: i32, %arg1: i32) -> (i32, i32) {
    %c0_i32 = arith.constant 0 : i32
    return %arg0, %arg1 : i32, i32
  }
}

</mosaic_0001>

<bundles_post_ra>
// kernel: tpu_custom_call.1
= control target key start
LH: loop header
LB: loop body
LE: loop exit
PB: predicated region body
PF: predicated region fallthrough
CT: control target
= control target key end

     0   :  { %10 = vsyncpa [#allocation4], 0  ;;  %s519_s0 = inlined_call_operand.hbm [shape: f32[16,32], index: 0, kind: input, shape index: {}]   ;;  %s520_s1 = inlined_call_operand.hbm [shape: f32[32,128], index: 1, kind: input, shape index: {}]   ;;  %s521_s2 = inlined_call_operand.vmem [shape: f32[1,128], index: 2, kind: input, shape index: {}]   ;;  %s522_s3 = inlined_call_operand.hbm [shape: f32[128,128], index: 3, kind: input, shape index: {}]   ;;  %s523_s4 = inlined_call_operand.vmem [shape: f32[1,128], index: 4, kind: input, shape index: {}]   ;;  %s524_s5 = inlined_call_operand.hbm [shape: f32[16,128], index: 5, kind: output, shape index: {}]  }
   0x1   :  { %11 = vsyncpa [#allocation7], 0 }
   0x2   :  { %12 = vsyncpa [#allocation5], 0  ;;  %s451_s18 = smov [#allocation6]   ;;  %s452_s20 = smov [#allocation3]  }
   0x3   :  { %s30_s19 = sshll.u32 %s451_s18, 4  ;;  %s18_s21 = sshll.u32 %s452_s20, 4  ;;  %s31_s19 = int_to_ptr.vmem [resolvable:$true] %s30_s19  ;;  %s19_s21 = int_to_ptr.vmem [resolvable:$true] %s18_s21 }
   0x4   :  { %s373_s22 = scalar_lea.vmem %s31_s19, 512  ;;  %p378_p1 = scmp.lt.s32.totalorder %s31_s19, %s31_s19 }
   0x5   :  { %p374_p0 = scmp.ne.s32.totalorder %s31_s19, %s373_s22  ;;  %p379_p2 = scmp.lt.s32.totalorder %s373_s22, %s373_s22 }
   0x7   :  { %p380_p3 = por %p379_p2, %p378_p1 }
   0x9   :  { %p381_p4 = pnand %p380_p3, %p374_p0 }
   0xb   :  { %384 = shalt.err (!%p381_p4)
}
   0xc   :  { %s453_s23 = smov 128   ;;  %s454_s24 = smov 8  }
   0xd   :  { %36 = dma.hbm_to_vmem [thread:$0]  %s520_s1, 512, %s31_s19, [#allocation7], %s453_s23, %s453_s23, %s454_s24  }
   0xe   :  { %s393_s27 = scalar_lea.vmem %s19_s21, 256  ;;  %p398_p6 = scmp.lt.s32.totalorder %s19_s21, %s19_s21 }
   0xf   :  { %p394_p5 = scmp.ne.s32.totalorder %s19_s21, %s393_s27  ;;  %p399_p7 = scmp.lt.s32.totalorder %s393_s27, %s393_s27 }
  0x11   :  { %p400_p8 = por %p399_p7, %p398_p6 }
  0x13   :  { %p401_p9 = pnand %p400_p8, %p394_p5 }
  0x15   :  { %404 = shalt.err (!%p401_p9)
}
  0x16   :  { %24 = dma.hbm_to_vmem [thread:$0]  %s519_s0, 256, %s19_s21, [#allocation4], %s453_s23, %s453_s23, %s454_s24  }
  0x17   :  { %s455_s30 = smov [#allocation8]  }
  0x18   :  { %s44_s6 = sshll.u32 %s455_s30, 4  ;;  %s45_s6 = int_to_ptr.vmem [resolvable:$true] %s44_s6 }
  0x19   :  { %s413_s7 = scalar_lea.vmem %s45_s6, 2048  ;;  %p418_p11 = scmp.lt.s32.totalorder %s45_s6, %s45_s6 }
  0x1a   :  { %p414_p10 = scmp.ne.s32.totalorder %s45_s6, %s413_s7  ;;  %p419_p12 = scmp.lt.s32.totalorder %s413_s7, %s413_s7 }
  0x1c   :  { %p420_p13 = por %p419_p12, %p418_p11 }
  0x1e   :  { %p421_p0 = pnand %p420_p13, %p414_p10 }
  0x20   :  { %424 = shalt.err (!%p421_p0)
}
  0x21   :  { %50 = dma.hbm_to_vmem [thread:$0]  %s522_s3, 2048, %s45_s6, [#allocation7], %s453_s23, %s453_s23, %s454_s24  }
  0x22   :  { %445 = dma.done.wait [#allocation4], 256  }
  0x23   :  { %446 = vsyncadd [#allocation4], 4294967040 }
  0x24   :  { %447 = dma.done.wait [#allocation7], 2560  }
  0x25   :  { %448 = vsyncadd [#allocation7], 4294964736  ;;  %vm79_vm0 = vcmask 261120   ;;  %v71_v0 = vld [vmem:[#allocation6 + $0x18] sm:$0xff]  ;;  %v70_v1 = vld [vmem:[#allocation6 + $0x10] sm:$0xff]  ;;  %s456_s11 = smov [#allocation9]  }
  0x26   :  { %313 = vmatprep.subr.mxu0 %v71_v0  ;;  %v66_v2 = vld [vmem:[#allocation3] sm:$0xff]  ;;  %v69_v3 = vld [vmem:[#allocation6 + $0x8] sm:$0xff]  ;;  %v182_v4 = vld [vmem:[#allocation8 + $0x78] sm:$0xff]  ;;  %s272_s12 = sshll.u32 %s456_s11, 4  ;;  %s273_s12 = int_to_ptr.vmem [resolvable:$true] %s272_s12 }
  0x27   :  { %314 = vmatpush3.msra.mxu0 %v71_v0  ;;  %321 = vmatprep.mubr.msk.f32.mxu0 %vm79_vm0, %v66_v2  ;;  %v181_v5 = vld [vmem:[#allocation8 + $0x70] sm:$0xff]  ;;  %v68_v6 = vld [vmem:[#allocation6] sm:$0xff]  ;;  %v180_v7 = vld [vmem:[#allocation8 + $0x68] sm:$0xff]  ;;  %p430_p2 = scmp.lt.s32.totalorder %s273_s12, %s273_s12 }
  0x28   :  { %315 = vmatprep.subr.mxu0 %v70_v1  ;;  %324 = vmatprep.subr.mxu1 %v182_v4  ;;  %v67_v8 = vld [vmem:[#allocation3 + $0x8] sm:$0xff]  ;;  %v179_v9 = vld [vmem:[#allocation8 + $0x60] sm:$0xff]  ;;  %v177_v11 = vld [vmem:[#allocation8 + $0x50] sm:$0xff] }
  0x29   :  { %316 = vmatpush3.msra.mxu0 %v70_v1  ;;  %325 = vmatpush3.msra.mxu1 %v182_v4  ;;  %v178_v10 = vld [vmem:[#allocation8 + $0x58] sm:$0xff]  ;;  %v176_v12 = vld [vmem:[#allocation8 + $0x48] sm:$0xff]  ;;  %v175_v13 = vld [vmem:[#allocation8 + $0x40] sm:$0xff] }
  0x2a   :  { %317 = vmatprep.subr.mxu0 %v69_v3  ;;  %326 = vmatprep.subr.mxu1 %v181_v5  ;;  %v174_v14 = vld [vmem:[#allocation8 + $0x38] sm:$0xff]  ;;  %v173_v15 = vld [vmem:[#allocation8 + $0x30] sm:$0xff]  ;;  %v172_v16 = vld [vmem:[#allocation8 + $0x28] sm:$0xff] }
  0x2b   :  { %318 = vmatpush3.msra.mxu0 %v69_v3  ;;  %327 = vmatpush3.msra.mxu1 %v181_v5  ;;  %v171_v17 = vld [vmem:[#allocation8 + $0x20] sm:$0xff]  ;;  %v170_v18 = vld [vmem:[#allocation8 + $0x18] sm:$0xff]  ;;  %v169_v19 = vld [vmem:[#allocation8 + $0x10] sm:$0xff] }
  0x2c   :  { %319 = vmatprep.subr.mxu0 %v68_v6  ;;  %328 = vmatprep.subr.mxu1 %v180_v7  ;;  %v168_v20 = vld [vmem:[#allocation8 + $0x8] sm:$0xff]  ;;  %v167_v21 = vld [vmem:[#allocation8] sm:$0xff]  ;;  %v285_v22 = vld [vmem:[%s521_s2] ss:$0 sm:$0xff]  ;;  %s425_s2 = scalar_lea.vmem %s273_s12, 256 }
  0x2d   :  { %320 = vmatpush3.msra.mxu0 %v68_v6  ;;  %329 = vmatpush3.msra.mxu1 %v180_v7  ;;  %v288_v29 = vld [vmem:[%s523_s4] ss:$0 sm:$0xff]  ;;  %p426_p1 = scmp.ne.s32.totalorder %s273_s12, %s425_s2  ;;  %p431_p3 = scmp.lt.s32.totalorder %s425_s2, %s425_s2 }
  0x2e   :  { %322 = vmatmul.mubr.msk.f32.vlgmr.msra.gmra.mxu0 %vm79_vm0, %v67_v8  ;;  %330 = vmatprep.subr.mxu1 %v179_v9 }
  0x2f   :  { %331 = vmatpush3.msra.mxu1 %v179_v9  ;;  %p432_p4 = por %p431_p3, %p430_p2 }
  0x30   :  { %332 = vmatprep.subr.mxu1 %v178_v10 }
  0x31   :  { %333 = vmatpush3.msra.mxu1 %v178_v10  ;;  %p433_p5 = pnand %p432_p4, %p426_p1 }
  0x32   :  { %334 = vmatprep.subr.mxu1 %v177_v11 }
  0x33   :  { %335 = vmatpush3.msra.mxu1 %v177_v11 }
  0x34   :  { %336 = vmatprep.subr.mxu1 %v176_v12 }
  0x35   :  { %337 = vmatpush3.msra.mxu1 %v176_v12 }
  0x36   :  { %338 = vmatprep.subr.mxu1 %v175_v13 }
  0x37   :  { %339 = vmatpush3.msra.mxu1 %v175_v13 }
  0x38   :  { %340 = vmatprep.subr.mxu1 %v174_v14 }
  0x39   :  { %341 = vmatpush3.msra.mxu1 %v174_v14 }
  0x3a   :  { %342 = vmatprep.subr.mxu1 %v173_v15 }
  0x3b   :  { %343 = vmatpush3.msra.mxu1 %v173_v15 }
  0x3c   :  { %344 = vmatprep.subr.mxu1 %v172_v16 }
  0x3d   :  { %345 = vmatpush3.msra.mxu1 %v172_v16 }
  0x3e   :  { %346 = vmatprep.subr.mxu1 %v171_v17 }
  0x3f   :  { %347 = vmatpush3.msra.mxu1 %v171_v17 }
  0x40   :  { %348 = vmatprep.subr.mxu1 %v170_v18 }
  0x41   :  { %349 = vmatpush3.msra.mxu1 %v170_v18 }
  0x42   :  { %350 = vmatprep.subr.mxu1 %v169_v19 }
  0x43   :  { %351 = vmatpush3.msra.mxu1 %v169_v19 }
  0x44   :  { %352 = vmatprep.subr.mxu1 %v168_v20 }
  0x45   :  { %353 = vmatpush3.msra.mxu1 %v168_v20 }
  0x46   :  { %354 = vmatprep.subr.mxu1 %v167_v21 }
  0x47   :  { %355 = vmatpush3.msra.mxu1 %v167_v21 }
  0xee   :  { %v323_v23 = vpop.f32.mrf.mxu0 }
  0xef   :  { %v158_v24 = vadd.f32 %v323_v23, %v285_v22 }
  0xf0   :  { %v152_v25 = vpop.f32.mrf.mxu0 }
  0xf1   :  { %v153_v26 = vadd.f32 %v285_v22, %v152_v25  ;;  %v162_v28 = vmax.f32 %v158_v24, 0.0 }
  0xf3   :  { %v161_v27 = vmax.f32 %v153_v26, 0.0 }
  0xf5   :  { %356 = vmatprep.mubr.f32.mxu1 %v161_v27 }
  0xf6   :  { %357 = vmatmul.mubr.f32.vlgmr.msra.gmra.mxu1 %v162_v28 }
 0x1b6   :  { %v358_v30 = vpop.f32.mrf.mxu1 }
 0x1b7   :  { %v262_v31 = vadd.f32 %v358_v30, %v288_v29 }
 0x1b8   :  { %v256_v32 = vpop.f32.mrf.mxu1 }
 0x1b9   :  { %266 = vst [vmem:[#allocation9 + $0x8] sm:$0xff] %v262_v31  ;;  %v257_v33 = vadd.f32 %v288_v29, %v256_v32 }
 0x1bb   :  { %265 = vst [vmem:[#allocation9] sm:$0xff] %v257_v33 }
 0x1bc   :  { %436 = shalt.err (!%p433_p5)
}
 0x1bd   :  { %278 = dma.vmem_to_hbm [thread:$0]  %s273_s12, 256, %s524_s5, [#allocation5], %s453_s23, %s453_s23, %s454_s24  }
 0x1be   :  { %449 = dma.done.wait [#allocation5], 256  }
 0x1bf   :  { %450 = vsyncadd [#allocation5], 4294967040 }
 0x1c0   :  { %282 = vsyncpa [#allocation4], 1 }
 0x1c1   :  { %283 = vsyncpa [#allocation7], 1 }
 0x1c2   :  { %284 = vsyncpa [#allocation5], 1 }

</bundles_post_ra>
